<compile_context>
chip_gen: v5e
topology: v5e:2x2
jax: 0.10.0
libtpu: 0.0.40
codegen_flags: <defaults>
</compile_context>

<pallas_src>
import jax
import jax.numpy as jnp
from jax.experimental import pallas as pl
from jax.experimental.pallas import tpu as pltpu


def _round_up(a, m):
    return (a + m - 1) // m * m


def decisioner_fc_kernel(x_ref, w1_ref, b1_ref, w2_ref, b2_ref, w3_ref, b3_ref, o_ref):
    # One (TB, input_dim) batch tile; weights are VMEM-resident.
    x = x_ref[...]                                                     # bf16
    h1 = jnp.dot(x, w1_ref[...], preferred_element_type=jnp.float32) + b1_ref[...]
    h1 = jnp.maximum(h1, 0.0)                                          # relu(fc1), f32
    # dropout1: identity in eval mode
    h2 = jnp.dot(h1.astype(jnp.bfloat16), w2_ref[...],
                 preferred_element_type=jnp.float32) + b2_ref[...]
    h2 = jnp.maximum(h2, 0.0)                                          # relu(fc2), f32
    # dropout2: identity in eval mode
    out = jnp.dot(h2.astype(jnp.bfloat16), w3_ref[...],
                  preferred_element_type=jnp.float32) + b3_ref[...]
    o_ref[...] = out.astype(o_ref.dtype)


def decisioner_fc(x, params, *, tb_max=1024):
    """x: (B, input_dim) float. params: dict of w1,b1,w2,b2,w3,b3 (f32)."""
    w1 = params["w1"].astype(jnp.bfloat16)
    w2 = params["w2"].astype(jnp.bfloat16)
    w3 = params["w3"].astype(jnp.float32)
    b1 = params["b1"].astype(jnp.float32)
    b2 = params["b2"].astype(jnp.float32)
    b3 = params["b3"].astype(jnp.float32)

    B, input_dim = x.shape
    num_classes = w3.shape[1]
    d1 = w1.shape[1]          # 128
    d2 = w2.shape[1]          # 64

    # Lane-dense output: pad fc3 output dim to a multiple of 128 lanes.
    n3 = max(128, _round_up(num_classes, 128))
    w3p = jnp.zeros((d2, n3), jnp.float32).at[:, :num_classes].set(w3).astype(jnp.bfloat16)
    b3p = jnp.zeros((1, n3), jnp.float32).at[:, :num_classes].set(b3)

    # Batch tile: multiple of 8 sublanes, up to tb_max rows; pad B to a multiple of TB.
    TB = min(tb_max, _round_up(B, 8))
    Bp = _round_up(B, TB)
    xp = jnp.zeros((Bp, input_dim), jnp.bfloat16).at[:B, :].set(x.astype(jnp.bfloat16))

    grid = (Bp // TB,)
    const = lambda i: (0, 0)   # weights/biases stay VMEM-resident across batch tiles

    out = pl.pallas_call(
        decisioner_fc_kernel,
        out_shape=jax.ShapeDtypeStruct((Bp, n3), jnp.float32),
        grid=grid,
        in_specs=[
            pl.BlockSpec((TB, input_dim), lambda i: (i, 0)),   # x tile (double-buffered)
            pl.BlockSpec((input_dim, d1), const),              # w1
            pl.BlockSpec((1, d1), const),                      # b1
            pl.BlockSpec((d1, d2), const),                     # w2
            pl.BlockSpec((1, d2), const),                      # b2
            pl.BlockSpec((d2, n3), const),                     # w3 (lane-padded)
            pl.BlockSpec((1, n3), const),                      # b3 (lane-padded)
        ],
        out_specs=pl.BlockSpec((TB, n3), lambda i: (i, 0)),
        compiler_params=pltpu.CompilerParams(
            dimension_semantics=("parallel",),                 # megacore on v7x
        ),
    )(xp, w1, b1, w2, b2, w3p, b3p)

    return out[:B, :num_classes]


def init_params(key, num_classes, num_steps):
    """Deterministic init mirroring nn.Linear default (U(-1/sqrt(in), 1/sqrt(in)))."""
    input_dim = num_steps * num_classes
    dims = [(input_dim, 128), (128, 64), (64, num_classes)]
    params = {}
    for idx, (fin, fout) in enumerate(dims, start=1):
        key, kw, kb = jax.random.split(key, 3)
        bound = 1.0 / jnp.sqrt(jnp.float32(fin))
        params[f"w{idx}"] = jax.random.uniform(
            kw, (fin, fout), jnp.float32, minval=-bound, maxval=bound)
        params[f"b{idx}"] = jax.random.uniform(
            kb, (1, fout), jnp.float32, minval=-bound, maxval=bound)
    return params


if __name__ == "__main__":
    num_classes = 4
    num_steps = 8
    batch = 2
    input_dim = num_steps * num_classes

    key = jax.random.PRNGKey(0)
    key, kx = jax.random.split(key)
    x = jax.random.normal(kx, (batch, input_dim), jnp.float32)
    params = init_params(key, num_classes, num_steps)

    out = decisioner_fc(x, params)
    out = jax.block_until_ready(out)

    # Pure-JAX f32 reference (dropout = identity in eval mode). Tolerance loosened
    # because the kernel uses bf16 matmul operands with f32 accumulation.
    h1 = jnp.maximum(x @ params["w1"] + params["b1"], 0.0)
    h2 = jnp.maximum(h1 @ params["w2"] + params["b2"], 0.0)
    ref = h2 @ params["w3"] + params["b3"]

    assert out.shape == (batch, num_classes)
    assert jnp.allclose(out, ref, atol=5e-2, rtol=5e-2)

    print("KERNEL_OK")
</pallas_src>

<mosaic_0001>
module attributes {stable_mosaic.version = 11 : i64} {
  func.func @decisioner_fc_kernel(%arg0: i32, %arg1: memref<8x32xbf16, #tpu.memory_space<vmem>>, %arg2: memref<32x128xbf16, #tpu.memory_space<vmem>>, %arg3: memref<1x128xf32, #tpu.memory_space<vmem>>, %arg4: memref<128x64xbf16, #tpu.memory_space<vmem>>, %arg5: memref<1x64xf32, #tpu.memory_space<vmem>>, %arg6: memref<64x128xbf16, #tpu.memory_space<vmem>>, %arg7: memref<1x128xf32, #tpu.memory_space<vmem>>, %arg8: memref<8x128xf32, #tpu.memory_space<vmem>>) attributes {dimension_semantics = [#tpu.dimension_semantics<parallel>], iteration_bounds = array<i64: 1>, scalar_prefetch = 0 : i64, scratch_operands = 0 : i64, tpu.core_type = #tpu.core_type<tc>, window_params = [{transform_indices = @transform_0, window_bounds = array<i64: 8, 32>}, {pipeline_mode = #tpu.pipeline_mode<synchronous>, transform_indices = @transform_1, window_bounds = array<i64: 32, 128>}, {pipeline_mode = #tpu.pipeline_mode<synchronous>, transform_indices = @transform_2, window_bounds = array<i64: 1, 128>}, {pipeline_mode = #tpu.pipeline_mode<synchronous>, transform_indices = @transform_3, window_bounds = array<i64: 128, 64>}, {pipeline_mode = #tpu.pipeline_mode<synchronous>, transform_indices = @transform_4, window_bounds = array<i64: 1, 64>}, {pipeline_mode = #tpu.pipeline_mode<synchronous>, transform_indices = @transform_5, window_bounds = array<i64: 64, 128>}, {pipeline_mode = #tpu.pipeline_mode<synchronous>, transform_indices = @transform_6, window_bounds = array<i64: 1, 128>}, {transform_indices = @transform_7, window_bounds = array<i64: 8, 128>}]} {
    %c0 = arith.constant 0 : index
    %c0_0 = arith.constant 0 : index
    %0 = vector.load %arg1[%c0, %c0_0] : memref<8x32xbf16, #tpu.memory_space<vmem>>, vector<8x32xbf16>
    %c0_1 = arith.constant 0 : index
    %c0_2 = arith.constant 0 : index
    %1 = vector.load %arg2[%c0_1, %c0_2] : memref<32x128xbf16, #tpu.memory_space<vmem>>, vector<32x128xbf16>
    %cst = arith.constant dense<0.000000e+00> : vector<8x128xf32>
    %2 = tpu.matmul %0, %1, %cst {dimension_numbers = #tpu.dot_dimension_numbers<[1], [0], [0], [1], [0, 0, 1, 1], [], []>} : vector<8x32xbf16>, vector<32x128xbf16>, vector<8x128xf32> -> vector<8x128xf32>
    %c0_3 = arith.constant 0 : index
    %c0_4 = arith.constant 0 : index
    %3 = vector.load %arg3[%c0_3, %c0_4] : memref<1x128xf32, #tpu.memory_space<vmem>>, vector<1x128xf32>
    %4 = vector.broadcast %3 : vector<1x128xf32> to vector<8x128xf32>
    %5 = arith.addf %2, %4 : vector<8x128xf32>
    %cst_5 = arith.constant 0.000000e+00 : f32
    %6 = vector.broadcast %cst_5 : f32 to vector<8x128xf32>
    %7 = arith.maximumf %5, %6 : vector<8x128xf32>
    %8 = arith.truncf %7 : vector<8x128xf32> to vector<8x128xbf16>
    %c0_6 = arith.constant 0 : index
    %c0_7 = arith.constant 0 : index
    %9 = vector.load %arg4[%c0_6, %c0_7] : memref<128x64xbf16, #tpu.memory_space<vmem>>, vector<128x64xbf16>
    %cst_8 = arith.constant dense<0.000000e+00> : vector<8x64xf32>
    %10 = tpu.matmul %8, %9, %cst_8 {dimension_numbers = #tpu.dot_dimension_numbers<[1], [0], [0], [1], [0, 0, 1, 1], [], []>} : vector<8x128xbf16>, vector<128x64xbf16>, vector<8x64xf32> -> vector<8x64xf32>
    %c0_9 = arith.constant 0 : index
    %c0_10 = arith.constant 0 : index
    %11 = vector.load %arg5[%c0_9, %c0_10] : memref<1x64xf32, #tpu.memory_space<vmem>>, vector<1x64xf32>
    %12 = vector.broadcast %11 : vector<1x64xf32> to vector<8x64xf32>
    %13 = arith.addf %10, %12 : vector<8x64xf32>
    %cst_11 = arith.constant 0.000000e+00 : f32
    %14 = vector.broadcast %cst_11 : f32 to vector<8x64xf32>
    %15 = arith.maximumf %13, %14 : vector<8x64xf32>
    %16 = arith.truncf %15 : vector<8x64xf32> to vector<8x64xbf16>
    %c0_12 = arith.constant 0 : index
    %c0_13 = arith.constant 0 : index
    %17 = vector.load %arg6[%c0_12, %c0_13] : memref<64x128xbf16, #tpu.memory_space<vmem>>, vector<64x128xbf16>
    %cst_14 = arith.constant dense<0.000000e+00> : vector<8x128xf32>
    %18 = tpu.matmul %16, %17, %cst_14 {dimension_numbers = #tpu.dot_dimension_numbers<[1], [0], [0], [1], [0, 0, 1, 1], [], []>} : vector<8x64xbf16>, vector<64x128xbf16>, vector<8x128xf32> -> vector<8x128xf32>
    %c0_15 = arith.constant 0 : index
    %c0_16 = arith.constant 0 : index
    %19 = vector.load %arg7[%c0_15, %c0_16] : memref<1x128xf32, #tpu.memory_space<vmem>>, vector<1x128xf32>
    %20 = vector.broadcast %19 : vector<1x128xf32> to vector<8x128xf32>
    %21 = arith.addf %18, %20 : vector<8x128xf32>
    %c0_17 = arith.constant 0 : index
    %c0_18 = arith.constant 0 : index
    %22 = vector.load %arg8[%c0_17, %c0_18] : memref<8x128xf32, #tpu.memory_space<vmem>>, vector<8x128xf32>
    tpu.vector_store %arg8[%c0_17, %c0_18], %21 {strides = array<i32>} : memref<8x128xf32, #tpu.memory_space<vmem>>, vector<8x128xf32>,
    return
  }
  func.func @transform_0(%arg0: i32) -> (i32, i32) {
    %c0_i32 = arith.constant 0 : i32
    %c0_i32_0 = arith.constant 0 : i32
    return %arg0, %c0_i32 : i32, i32
  }
  func.func @transform_1(%arg0: i32) -> (i32, i32) {
    %c0_i32 = arith.constant 0 : i32
    %c0_i32_0 = arith.constant 0 : i32
    %c0_i32_1 = arith.constant 0 : i32
    return %c0_i32, %c0_i32_0 : i32, i32
  }
  func.func @transform_2(%arg0: i32) -> (i32, i32) {
    %c0_i32 = arith.constant 0 : i32
    %c0_i32_0 = arith.constant 0 : i32
    %c0_i32_1 = arith.constant 0 : i32
    return %c0_i32, %c0_i32_0 : i32, i32
  }
  func.func @transform_3(%arg0: i32) -> (i32, i32) {
    %c0_i32 = arith.constant 0 : i32
    %c0_i32_0 = arith.constant 0 : i32
    %c0_i32_1 = arith.constant 0 : i32
    return %c0_i32, %c0_i32_0 : i32, i32
  }
  func.func @transform_4(%arg0: i32) -> (i32, i32) {
    %c0_i32 = arith.constant 0 : i32
    %c0_i32_0 = arith.constant 0 : i32
    %c0_i32_1 = arith.constant 0 : i32
    return %c0_i32, %c0_i32_0 : i32, i32
  }
  func.func @transform_5(%arg0: i32) -> (i32, i32) {
    %c0_i32 = arith.constant 0 : i32
    %c0_i32_0 = arith.constant 0 : i32
    %c0_i32_1 = arith.constant 0 : i32
    return %c0_i32, %c0_i32_0 : i32, i32
  }
  func.func @transform_6(%arg0: i32) -> (i32, i32) {
    %c0_i32 = arith.constant 0 : i32
    %c0_i32_0 = arith.constant 0 : i32
    %c0_i32_1 = arith.constant 0 : i32
    return %c0_i32, %c0_i32_0 : i32, i32
  }
  func.func @transform_7(%arg0: i32) -> (i32, i32) {
    %c0_i32 = arith.constant 0 : i32
    %c0_i32_0 = arith.constant 0 : i32
    return %arg0, %c0_i32 : i32, i32
  }
}

</mosaic_0001>

<bundles_post_ra>
// kernel: tpu_custom_call.1
= control target key start
LH: loop header
LB: loop body
LE: loop exit
PB: predicated region body
PF: predicated region fallthrough
CT: control target
= control target key end

     0   :  { %s421_s0 = inlined_call_operand.vmem [shape: bf16[8,32], index: 0, kind: input, shape index: {}]   ;;  %s422_s1 = inlined_call_operand.vmem [shape: bf16[32,128], index: 1, kind: input, shape index: {}]   ;;  %s423_s2 = inlined_call_operand.vmem [shape: f32[1,128], index: 2, kind: input, shape index: {}]   ;;  %s424_s3 = inlined_call_operand.vmem [shape: bf16[128,64], index: 3, kind: input, shape index: {}]   ;;  %s425_s4 = inlined_call_operand.vmem [shape: f32[1,64], index: 4, kind: input, shape index: {}]   ;;  %s426_s5 = inlined_call_operand.vmem [shape: bf16[64,128], index: 5, kind: input, shape index: {}]   ;;  %s427_s6 = inlined_call_operand.vmem [shape: f32[1,128], index: 6, kind: input, shape index: {}]   ;;  %s428_s7 = inlined_call_operand.hbm [shape: f32[8,128], index: 7, kind: output, shape index: {}]  }
   0x1   :  { %v280_v0 = vld [vmem:[%s422_s1 + $0x8] sm:$0xff]  ;;  %v288_v1 = vld [vmem:[%s424_s3 + $0x38] sm:$0xff]  ;;  %v279_v2 = vld [vmem:[%s422_s1] sm:$0xff] }
   0x2   :  { %59 = vmatpush.bf16.msra.mxu0 %v280_v0  ;;  %136 = vmatpush.bf16.msra.mxu1 %v288_v1  ;;  %v287_v3 = vld [vmem:[%s424_s3 + $0x30] sm:$0xff] }
   0x3   :  { %12 = vsyncpa [#allocation3], 0  ;;  %v28_v4 = vld [vmem:[%s421_s0] sm:$0xf]  ;;  %vm49_vm0 = vcmask 261120   ;;  %v286_v5 = vld [vmem:[%s424_s3 + $0x28] sm:$0xff] }
   0x4   :  { %v285_v6 = vld [vmem:[%s424_s3 + $0x20] sm:$0xff]  ;;  %v284_v7 = vld [vmem:[%s424_s3 + $0x18] sm:$0xff]  ;;  %v283_v8 = vld [vmem:[%s424_s3 + $0x10] sm:$0xff]  ;;  %vm187_vm1 = vcmask 523264   ;;  %s323_s10 = smov [#allocation2]   ;;  %s212_s1 = sshll.u32 %s428_s7, 4  ;;  %s213_s1 = int_to_ptr.hbm [resolvable:$true] %s212_s1 }
   0x5   :  { %v282_v9 = vld [vmem:[%s424_s3 + $0x8] sm:$0xff]  ;;  %v281_v10 = vld [vmem:[%s424_s3] sm:$0xff]  ;;  %v292_v11 = vld [vmem:[%s426_s5 + $0x18] sm:$0xff]  ;;  %s210_s11 = sshll.u32 %s323_s10, 4  ;;  %s211_s11 = int_to_ptr.vmem [resolvable:$true] %s210_s11 }
   0x6   :  { %60 = vmatpush.bf16.msra.mxu0 %v279_v2  ;;  %137 = vmatpush.bf16.msra.mxu1 %v287_v3  ;;  %v291_v12 = vld [vmem:[%s426_s5 + $0x10] sm:$0xff]  ;;  %v294_v13 = vld [vmem:[%s423_s2] ss:$0 sm:$0xff]  ;;  %v290_v19 = vld [vmem:[%s426_s5 + $0x8] sm:$0xff] }
   0x7   :  { %195 = vmatpush.bf16.msra.mxu2 %v292_v11  ;;  %v289_v20 = vld [vmem:[%s426_s5] sm:$0xff] }
   0x8   :  { %v295_v21 = vld [vmem:[%s425_s4] ss:$0 sm:$0xff] }
   0x9   :  { %229 = vmatmul.msk.bf16.vlgmr.msra.gmra.mxu0 %vm49_vm0, %v28_v4  ;;  %v296_v27 = vld [vmem:[%s427_s6] ss:$0 sm:$0xff] }
   0xa   :  { %138 = vmatpush.bf16.msra.mxu1 %v286_v5 }
   0xb   :  { %196 = vmatpush.bf16.msra.mxu2 %v291_v12 }
   0xe   :  { %139 = vmatpush.bf16.msra.mxu1 %v285_v6 }
   0xf   :  { %197 = vmatpush.bf16.msra.mxu2 %v290_v19 }
  0x12   :  { %140 = vmatpush.bf16.msra.mxu1 %v284_v7 }
  0x13   :  { %198 = vmatpush.bf16.msra.mxu2 %v289_v20 }
  0x16   :  { %141 = vmatpush.bf16.msra.mxu1 %v283_v8 }
  0x1a   :  { %142 = vmatpush.bf16.msra.mxu1 %v282_v9 }
  0x1e   :  { %143 = vmatpush.bf16.msra.mxu1 %v281_v10 }
  0x86   :  { %v62_v14 = vpop.f32.mrf.mxu0 }
  0x87   :  { %v63_v15 = vadd.f32 %v294_v13, %v62_v14 }
  0x89   :  { %v66_v16 = vmax.f32 %v63_v15, 0.0 }
  0x8b   :  { %v67_v17 = vpack.c.bf16 %v66_v16, %v66_v16 }
  0x8d   :  { %144 = vmatmul.bf16.vlgmr.msra.gmra.mxu1 %v67_v17 }
  0x8e   :  { %v64_v18 = vpop.f32.mrf.mxu0 }
 0x10a   :  { %v145_v22 = vpop.f32.mrf.mxu1 }
 0x10b   :  { %v146_v23 = vadd.f32 %v295_v21, %v145_v22 }
 0x10d   :  { %v149_v24 = vmax.f32 %v146_v23, 0.0 }
 0x10f   :  { %v150_v25 = vpack.c.bf16 %v149_v24, %v149_v24 }
 0x111   :  { %278 = vmatmul.msk.bf16.vlgmr.msra.gmra.mxu2 %vm187_vm1, %v150_v25 }
 0x112   :  { %v147_v26 = vpop.f32.mrf.mxu1 }
 0x194   :  { %v200_v28 = vpop.f32.mrf.mxu2 }
 0x195   :  { %v201_v29 = vadd.f32 %v296_v27, %v200_v28 }
 0x197   :  { %204 = vst [vmem:[#allocation2] sm:$0xff] %v201_v29 }
 0x198   :  { %215 = dma.vmem_to_hbm [thread:$0]  %s211_s11, 128, %s213_s1, [#allocation3]  }
 0x19c   :  { %v202_v30 = vpop.f32.mrf.mxu2 }
 0x19d   :  { %321 = dma.done.wait [#allocation3], 128  }
 0x19e   :  { %322 = vsyncadd [#allocation3], 4294967168 }
 0x19f   :  { %220 = vsyncpa [#allocation3], 1 }

</bundles_post_ra>
